<compile_context>
chip_gen: v6e
topology: v6e:2x2x1
jax: 0.10.0
libtpu: 0.0.40
codegen_flags: <defaults>
</compile_context>

<pallas_src>
import jax
import jax.numpy as jnp
from jax.experimental import pallas as pl
from jax.experimental.pallas import tpu as pltpu


def _round_up(x, m):
    return ((x + m - 1) // m) * m


def _skipgram_kernel(u_ref, v_ref, w_ref, b_ref, o_ref):
    # u_ref, v_ref: (TR, M)  gathered embeddings, natural row-major layout
    # w_ref:        (1, M)   fc1 weight (f32), broadcast over rows
    # b_ref:        (1, 1)   fc1 bias, SMEM scalar
    # o_ref:        (TR, 1)  per-token output
    u = u_ref[...].astype(jnp.float32)
    v = v_ref[...].astype(jnp.float32)
    prod = u * v                                   # VPU elementwise
    weighted = prod * w_ref[...]                   # (1, M) broadcast over sublanes
    # M-lane reduce lands on the XLU slot; output column + SMEM bias.
    o_ref[...] = jnp.sum(weighted, axis=1, keepdims=True) + b_ref[0, 0]


def skip_gram_forward(X, embed_u, embed_v, fc_w, fc_b, *,
                      row_tile=4096, transport_dtype=jnp.float32):
    """Pallas implementation of SkipGramModel.forward.

    X:        (B, N) int32 token indices (positive + negative samples)
    embed_u:  (vocab, M) float32
    embed_v:  (vocab, M) float32
    fc_w:     (1, M) float32   (nn.Linear(M, 1).weight)
    fc_b:     (1,)   float32   (nn.Linear(M, 1).bias)
    returns:  (B, N, 1) float32
    """
    B, N = X.shape
    M = embed_u.shape[1]

    idx = X.reshape(-1).astype(jnp.int32)
    R = idx.shape[0]

    # Row tile: multiple of 8 sublanes; clamp so tiny inputs stay a single block.
    tile = min(row_tile, _round_up(R, 8))
    tile = _round_up(tile, 8)
    Rp = _round_up(R, tile)

    # Pad the cheap index vector (4 B/token), NOT the gathered matrices.
    if Rp != R:
        idx = jnp.pad(idx, (0, Rp - R))

    # Gather in natural (Rp, M) layout -- no XLA transpose / pad passes over the
    # gathered working set.  (jnp.take clamps out-of-range ids, unlike
    # nn.Embedding which would raise.)
    U = jnp.take(embed_u, idx, axis=0).astype(transport_dtype)
    V = jnp.take(embed_v, idx, axis=0).astype(transport_dtype)

    w = fc_w.reshape(1, M).astype(jnp.float32)     # tiny; keep f32 for accuracy
    b = fc_b.reshape(1, 1).astype(jnp.float32)     # -> SMEM scalar

    itemsize = jnp.dtype(transport_dtype).itemsize
    cost = pl.CostEstimate(
        flops=3 * M * Rp,
        transcendentals=0,
        bytes_accessed=2 * Rp * M * itemsize + Rp * 4 + M * 4 + 4,
    )

    out = pl.pallas_call(
        _skipgram_kernel,
        out_shape=jax.ShapeDtypeStruct((Rp, 1), jnp.float32),
        grid_spec=pltpu.PrefetchScalarGridSpec(
            num_scalar_prefetch=0,
            grid=(Rp // tile,),
            in_specs=[
                pl.BlockSpec((tile, M), lambda i: (i, 0)),          # U tile
                pl.BlockSpec((tile, M), lambda i: (i, 0)),          # V tile
                pl.BlockSpec((1, M), lambda i: (0, 0)),             # fc1 weight
                pl.BlockSpec(memory_space=pltpu.MemorySpace.SMEM),  # fc1 bias
            ],
            out_specs=pl.BlockSpec((tile, 1), lambda i: (i, 0)),
        ),
        compiler_params=pltpu.CompilerParams(
            dimension_semantics=("parallel",),
            vmem_limit_bytes=32 * 1024 * 1024,
        ),
        cost_estimate=cost,
    )(U, V, w, b)

    return out[:R].reshape(B, N, 1)


if __name__ == "__main__":
    # Small, module-consistent shapes: vocab=100, embed_dim=40 (module default m=40),
    # batch=2, 8 samples per row.
    key = jax.random.PRNGKey(0)
    k1, k2, k3, k4, k5 = jax.random.split(key, 5)

    vocab, m = 100, 40
    B, N = 2, 8

    # nn.Embedding default init: N(0, 1)
    embed_u = jax.random.normal(k1, (vocab, m), jnp.float32)
    embed_v = jax.random.normal(k2, (vocab, m), jnp.float32)
    # nn.Linear(m, 1) default init: U(-1/sqrt(m), 1/sqrt(m))
    bound = 1.0 / (m ** 0.5)
    fc_w = jax.random.uniform(k3, (1, m), jnp.float32, -bound, bound)
    fc_b = jax.random.uniform(k4, (1,), jnp.float32, -bound, bound)

    X = jax.random.randint(k5, (B, N), 0, vocab, dtype=jnp.int32)

    # f32 path (exact PyTorch semantics).
    out = skip_gram_forward(X, embed_u, embed_v, fc_w, fc_b)
    out = jax.block_until_ready(out)

    # Pure-JAX reference of the PyTorch forward.
    ref = (embed_u[X] * embed_v[X]) @ fc_w.T + fc_b  # (B, N, 1)
    assert out.shape == (B, N, 1), out.shape
    assert jnp.allclose(out, ref, atol=1e-5), float(jnp.max(jnp.abs(out - ref)))

    # bf16-transport variant (halves the dominant HBM traffic; math stays f32).
    out_bf16 = skip_gram_forward(X, embed_u, embed_v, fc_w, fc_b,
                                 transport_dtype=jnp.bfloat16)
    out_bf16 = jax.block_until_ready(out_bf16)
    assert jnp.allclose(out_bf16, ref, atol=1e-1), float(jnp.max(jnp.abs(out_bf16 - ref)))

    print("KERNEL_OK")
</pallas_src>

<mosaic_0001>
module attributes {stable_mosaic.version = 11 : i64} {
  func.func @_skipgram_kernel(%arg0: i32, %arg1: memref<16x40xf32, #tpu.memory_space<vmem>>, %arg2: memref<16x40xf32, #tpu.memory_space<vmem>>, %arg3: memref<1x40xf32, #tpu.memory_space<vmem>>, %arg4: memref<1x1xf32, #tpu.memory_space<smem>>, %arg5: memref<16x1xf32, #tpu.memory_space<vmem>>) attributes {dimension_semantics = [#tpu.dimension_semantics<parallel>], iteration_bounds = array<i64: 1>, scalar_prefetch = 0 : i64, scratch_operands = 0 : i64, tpu.core_type = #tpu.core_type<tc>, window_params = [{transform_indices = @transform_0, window_bounds = array<i64: 16, 40>}, {transform_indices = @transform_1, window_bounds = array<i64: 16, 40>}, {pipeline_mode = #tpu.pipeline_mode<synchronous>, transform_indices = @transform_2, window_bounds = array<i64: 1, 40>}, {transform_indices = @transform_3, window_bounds = array<i64: 1, 1>}, {transform_indices = @transform_4, window_bounds = array<i64: 16, 1>}]} {
    %c0 = arith.constant 0 : index
    %c0_0 = arith.constant 0 : index
    %0 = vector.load %arg1[%c0, %c0_0] : memref<16x40xf32, #tpu.memory_space<vmem>>, vector<16x40xf32>
    %c0_1 = arith.constant 0 : index
    %c0_2 = arith.constant 0 : index
    %1 = vector.load %arg2[%c0_1, %c0_2] : memref<16x40xf32, #tpu.memory_space<vmem>>, vector<16x40xf32>
    %2 = arith.mulf %0, %1 : vector<16x40xf32>
    %c0_3 = arith.constant 0 : index
    %c0_4 = arith.constant 0 : index
    %3 = vector.load %arg3[%c0_3, %c0_4] : memref<1x40xf32, #tpu.memory_space<vmem>>, vector<1x40xf32>
    %4 = vector.broadcast %3 : vector<1x40xf32> to vector<16x40xf32>
    %5 = arith.mulf %2, %4 : vector<16x40xf32>
    %cst = arith.constant dense<0.000000e+00> : vector<16xf32>
    %6 = vector.multi_reduction <add>, %5, %cst [1] : vector<16x40xf32> to vector<16xf32>
    %7 = vector.shape_cast %6 : vector<16xf32> to vector<16x1xf32>
    %c0_5 = arith.constant 0 : index
    %c0_6 = arith.constant 0 : index
    %8 = memref.load %arg4[%c0_5, %c0_6] : memref<1x1xf32, #tpu.memory_space<smem>>
    %9 = vector.broadcast %8 : f32 to vector<16x1xf32>
    %10 = arith.addf %7, %9 : vector<16x1xf32>
    %c0_7 = arith.constant 0 : index
    %c0_8 = arith.constant 0 : index
    %11 = vector.load %arg5[%c0_7, %c0_8] : memref<16x1xf32, #tpu.memory_space<vmem>>, vector<16x1xf32>
    tpu.vector_store %arg5[%c0_7, %c0_8], %10 {strides = array<i32>} : memref<16x1xf32, #tpu.memory_space<vmem>>, vector<16x1xf32>,
    return
  }
  func.func @transform_0(%arg0: i32) -> (i32, i32) {
    %c0_i32 = arith.constant 0 : i32
    %c0_i32_0 = arith.constant 0 : i32
    return %arg0, %c0_i32 : i32, i32
  }
  func.func @transform_1(%arg0: i32) -> (i32, i32) {
    %c0_i32 = arith.constant 0 : i32
    %c0_i32_0 = arith.constant 0 : i32
    return %arg0, %c0_i32 : i32, i32
  }
  func.func @transform_2(%arg0: i32) -> (i32, i32) {
    %c0_i32 = arith.constant 0 : i32
    %c0_i32_0 = arith.constant 0 : i32
    %c0_i32_1 = arith.constant 0 : i32
    return %c0_i32, %c0_i32_0 : i32, i32
  }
  func.func @transform_3(%arg0: i32) -> (i32, i32) {
    %c0_i32 = arith.constant 0 : i32
    %c0_i32_0 = arith.constant 0 : i32
    %c0_i32_1 = arith.constant 0 : i32
    return %c0_i32, %c0_i32_0 : i32, i32
  }
  func.func @transform_4(%arg0: i32) -> (i32, i32) {
    %c0_i32 = arith.constant 0 : i32
    %c0_i32_0 = arith.constant 0 : i32
    return %arg0, %c0_i32 : i32, i32
  }
}

</mosaic_0001>

<bundles_post_ra>
// kernel: tpu_custom_call.1
= control target key start
LH: loop header
LB: loop body
LE: loop exit
PB: predicated region body
PF: predicated region fallthrough
CT: control target
= control target key end

     0   :  { %10 = vsyncpa [#allocation4], 0  ;;  %s177_s0 = inlined_call_operand.hbm [shape: f32[16,40], index: 0, kind: input, shape index: {}]   ;;  %s178_s1 = inlined_call_operand.hbm [shape: f32[16,40], index: 1, kind: input, shape index: {}]   ;;  %s179_s2 = inlined_call_operand.vmem [shape: f32[1,40], index: 2, kind: input, shape index: {}]   ;;  %s180_s3 = inlined_call_operand.<no memory space> [shape: f32[1,1], index: 3, kind: input, shape index: {}]   ;;  %s181_s4 = inlined_call_operand.vmem [shape: f32[16,1], index: 4, kind: output, shape index: {}]  }
   0x1   :  { %11 = vsyncpa [#allocation6], 0  ;;  %s130_s15 = smov [#allocation3]  }
   0x2   :  { %s17_s16 = sshll.u32 %s130_s15, 4  ;;  %s18_s16 = int_to_ptr.vmem [resolvable:$true] %s17_s16 }
   0x3   :  { %s94_s17 = scalar_lea.vmem %s18_s16, 256  ;;  %p99_p1 = scmp.lt.s32.totalorder %s18_s16, %s18_s16 }
   0x4   :  { %p95_p0 = scmp.ne.s32.totalorder %s18_s16, %s94_s17  ;;  %p100_p2 = scmp.lt.s32.totalorder %s94_s17, %s94_s17 }
   0x6   :  { %p101_p3 = por %p100_p2, %p99_p1 }
   0x8   :  { %p102_p4 = pnand %p101_p3, %p95_p0 }
   0xa   :  { %105 = shalt.err (!%p102_p4)
}
   0xb   :  { %s131_s18 = smov 128   ;;  %s132_s19 = smov 8  }
   0xc   :  { %23 = dma.hbm_to_vmem [thread:$0]  %s177_s0, 256, %s18_s16, [#allocation4], %s131_s18, %s131_s18, %s132_s19  }
   0xd   :  { %s133_s22 = smov [#allocation5]  }
   0xe   :  { %s29_s23 = sshll.u32 %s133_s22, 4  ;;  %s30_s23 = int_to_ptr.vmem [resolvable:$true] %s29_s23 }
   0xf   :  { %s114_s24 = scalar_lea.vmem %s30_s23, 256  ;;  %p119_p6 = scmp.lt.s32.totalorder %s30_s23, %s30_s23 }
  0x10   :  { %p115_p5 = scmp.ne.s32.totalorder %s30_s23, %s114_s24  ;;  %p120_p7 = scmp.lt.s32.totalorder %s114_s24, %s114_s24 }
  0x12   :  { %p121_p8 = por %p120_p7, %p119_p6 }
  0x14   :  { %p122_p9 = pnand %p121_p8, %p115_p5 }
  0x16   :  { %125 = shalt.err (!%p122_p9)
}
  0x17   :  { %35 = dma.hbm_to_vmem [thread:$0]  %s178_s1, 256, %s30_s23, [#allocation6], %s131_s18, %s131_s18, %s132_s19  }
  0x18   :  { %126 = dma.done.wait [#allocation4], 256  }
  0x19   :  { %127 = vsyncadd [#allocation4], 4294967040 }
  0x1a   :  { %128 = dma.done.wait [#allocation6], 256  }
  0x1b   :  { %129 = vsyncadd [#allocation6], 4294967040  ;;  %v46_v0 = vld [vmem:[#allocation3] sm:$0xff]  ;;  %v48_v1 = vld [vmem:[#allocation5] sm:$0xff]  ;;  %vm61_vm0 = vcmask 326656   ;;  %v69_v11 = vstv %s180_s3  ;;  %vm72_vm1 = vcmask 7168  }
  0x1c   :  { %v81_v2 = vld [vmem:[%s179_s2] ss:$0 sm:$0xff]  ;;  %v50_v3 = vmul.f32 %v48_v1, %v46_v0  ;;  %v47_v4 = vld [vmem:[#allocation3 + $0x8] sm:$0xff]  ;;  %v49_v5 = vld [vmem:[#allocation5 + $0x8] sm:$0xff] }
  0x1d   :  { %v51_v6 = vmul.f32 %v49_v5, %v47_v4 }
  0x1e   :  { %v59_v7 = vmul.f32 %v81_v2, %v50_v3 }
  0x1f   :  { %v60_v8 = vmul.f32 %v81_v2, %v51_v6 }
  0x20   :  { %v62_v9 = vsel %vm61_vm0, %v59_v7, 0.0 }
  0x21   :  { %63 = vadd.xlane.f32.xlu0 %v62_v9  ;;  %v65_v10 = vsel %vm61_vm0, %v60_v8, 0.0 }
  0x25   :  { %66 = vadd.xlane.f32.xlu0 %v65_v10 }
  0xaa   :  { %v64_v12 = vpop.xlane.xlu0 %63 }
  0xab   :  { %v70_v13 = vadd.f32 %v69_v11, %v64_v12 }
  0xad   :  { %73 = vst.msk [vmem:[%s181_s4] sm:$0xff] %vm72_vm1, %v70_v13 }
  0xae   :  { %v67_v14 = vpop.xlane.xlu0 %66 }
  0xaf   :  { %v71_v15 = vadd.f32 %v69_v11, %v67_v14 }
  0xb1   :  { %74 = vst.msk [vmem:[%s181_s4 + $0x8] sm:$0xff] %vm72_vm1, %v71_v15 }
  0xb2   :  { %79 = vsyncpa [#allocation4], 1 }
  0xb3   :  { %80 = vsyncpa [#allocation6], 1 }

</bundles_post_ra>
